<compile_context>
chip_gen: v5e
topology: v5e:2x2
jax: 0.10.0
libtpu: 0.0.40
codegen_flags: <defaults>
</compile_context>

<pallas_src>
import functools

import jax
import jax.numpy as jnp
from jax.experimental import pallas as pl
from jax.experimental.pallas import tpu as pltpu

_LANES = 128            # vreg lane width; last slab dim
_MAX_TILE_ROWS = 2048   # 2048 * 128 * 4 B = 1 MiB per f32 buffer


def _hash_u32(h):
    """lowbias32 avalanche hash on uint32 vectors (pure VPU int ops)."""
    h = h ^ (h >> 16)
    h = h * jnp.uint32(0x7FEB352D)
    h = h ^ (h >> 15)
    h = h * jnp.uint32(0x846CA68B)
    h = h ^ (h >> 16)
    return h


def _tile_random_bits(seed_ref, tile_r):
    """One uint32 of counter-hash randomness per element of the current tile."""
    # Global element offset of this tile (uint32, counter-based PRNG); the seed
    # key is folded into the same scalar so the vector path sees a single add.
    base = pl.program_id(0).astype(jnp.uint32) * jnp.uint32(tile_r * _LANES)
    off = base + seed_ref[0].astype(jnp.uint32) * jnp.uint32(0x9E3779B9)
    row = jax.lax.broadcasted_iota(jnp.int32, (tile_r, _LANES), 0)
    col = jax.lax.broadcasted_iota(jnp.int32, (tile_r, _LANES), 1)
    lin = ((row << 7) | col).astype(jnp.uint32)   # row * 128 + col (lanes == 128)
    return _hash_u32(lin + off)


def _dropout1_kernel(seed_ref, x_ref, o_ref, *, thresh, scale, tile_r):
    """Inverted dropout on a single plane (real-dtype inputs)."""
    bits = _tile_random_bits(seed_ref, tile_r)
    x = x_ref[...].astype(jnp.float32)
    keep = bits >= jnp.uint32(thresh)              # P[keep] = 1 - p
    o_ref[...] = jnp.where(keep, x * jnp.float32(scale), 0.0).astype(o_ref.dtype)


def _dropout2_kernel(seed_ref, xr_ref, xi_ref, or_ref, oi_ref, *,
                     thresh16, scale, tile_r):
    """Independent inverted dropout on the real & imag planes.

    One 32-bit hash per element pair; the two keep decisions come from the
    disjoint 16-bit halves compared against a 16-bit threshold.
    """
    bits = _tile_random_bits(seed_ref, tile_r)
    thr = jnp.uint32(thresh16)
    sc = jnp.float32(scale)
    keep_r = (bits & jnp.uint32(0xFFFF)) >= thr
    keep_i = (bits >> 16) >= thr
    or_ref[...] = jnp.where(keep_r, xr_ref[...].astype(jnp.float32) * sc,
                            0.0).astype(or_ref.dtype)
    oi_ref[...] = jnp.where(keep_i, xi_ref[...].astype(jnp.float32) * sc,
                            0.0).astype(oi_ref.dtype)


def _dropout_pallas(planes, p, seed):
    """Apply inverted dropout to 1 (real) or 2 (real+imag) same-shape planes."""
    n = len(planes)
    assert n in (1, 2)
    shape = planes[0].shape
    total = planes[0].size
    dt = planes[0].dtype

    # Stream native dtype when the TPU supports it; otherwise fall back to f32
    # (e.g. float64 real inputs lose precision -- acceptable parity tradeoff).
    compute_dt = dt if dt in (jnp.float32, jnp.bfloat16, jnp.float16) else jnp.float32
    sub = 8 if compute_dt == jnp.float32 else 16   # sublane multiple for dtype

    pad = (-total) % _LANES                        # pad only to a lane boundary
    rows = (total + pad) // _LANES

    # Biggest tile that still gives >=4 grid steps (v7x 2-TC sharding), capped
    # at ~1 MiB/buffer, rounded to the sublane multiple.
    tile_r = min(_MAX_TILE_ROWS,
                 max(sub, ((pl.cdiv(rows, 4) + sub - 1) // sub) * sub))
    grid = (pl.cdiv(rows, tile_r),)                # partial last block is fine

    def slab(a):
        f = a.astype(compute_dt).reshape(-1)
        if pad:
            f = jnp.pad(f, (0, pad))
        return f.reshape(rows, _LANES)

    slabs = [slab(a) for a in planes]
    seed_arr = jnp.array([int(seed) & 0x7FFFFFFF], dtype=jnp.int32)
    scale = 1.0 / (1.0 - float(p))                 # p must be a static float

    if n == 1:
        thresh = min(int(round(float(p) * 2.0 ** 32)), 2 ** 32 - 1)
        kernel = functools.partial(_dropout1_kernel, thresh=thresh,
                                   scale=scale, tile_r=tile_r)
    else:
        thresh16 = min(int(round(float(p) * 65536.0)), 65535)
        kernel = functools.partial(_dropout2_kernel, thresh16=thresh16,
                                   scale=scale, tile_r=tile_r)

    blk = pl.BlockSpec((tile_r, _LANES), lambda i, seed_ref: (i, 0))
    out_shape = tuple(jax.ShapeDtypeStruct((rows, _LANES), compute_dt)
                      for _ in range(n))

    outs = pl.pallas_call(
        kernel,
        out_shape=out_shape,
        grid_spec=pltpu.PrefetchScalarGridSpec(
            num_scalar_prefetch=1,
            grid=grid,
            in_specs=[blk] * n,
            out_specs=[blk] * n,
        ),
        compiler_params=pltpu.CompilerParams(
            dimension_semantics=("parallel",),
            vmem_limit_bytes=32 * 1024 * 1024),
    )(seed_arr, *slabs)

    if not isinstance(outs, (tuple, list)):
        outs = (outs,)

    def unslab(o):
        o = o.reshape(-1)
        if pad:
            o = o[:total]
        return o.reshape(shape).astype(dt)

    return [unslab(o) for o in outs]


def complex_dropout(x, p=0.5, training=True, seed=0):
    """JAX/Pallas equivalent of dropout_complex / ComplexDropout.forward."""
    if not training or p == 0.0:
        return x
    if p >= 1.0:
        return jnp.zeros_like(x)
    if jnp.iscomplexobj(x):
        out_r, out_i = _dropout_pallas([jnp.real(x), jnp.imag(x)], p, seed)
        return jax.lax.complex(out_r, out_i)
    # Real-tensor branch of dropout_complex (plain F.dropout): single plane.
    (out,) = _dropout_pallas([x], p, seed)
    return out


if __name__ == "__main__":
    key = jax.random.PRNGKey(0)
    kr, ki = jax.random.split(key)
    B, C, H, W = 2, 4, 16, 16
    x_real = jax.random.normal(kr, (B, C, H, W), dtype=jnp.float32)
    x_imag = jax.random.normal(ki, (B, C, H, W), dtype=jnp.float32)
    x = jax.lax.complex(x_real, x_imag)  # complex64, mirrors torch complex input

    p = 0.5
    y = jax.block_until_ready(complex_dropout(x, p=p, training=True, seed=1234))
    assert y.shape == x.shape and y.dtype == jnp.complex64

    # Surviving elements are scaled by 1/(1-p); dropped ones are exactly 0.
    yr, yi = jnp.real(y), jnp.imag(y)
    kept_r = jnp.abs(yr) > 0
    kept_i = jnp.abs(yi) > 0
    assert jnp.allclose(jnp.where(kept_r, yr, 0.0),
                        jnp.where(kept_r, x_real / (1.0 - p), 0.0), atol=1e-5)
    assert jnp.allclose(jnp.where(kept_i, yi, 0.0),
                        jnp.where(kept_i, x_imag / (1.0 - p), 0.0), atol=1e-5)

    # Keep-rate sanity (loose): near 1-p, real/imag masks independent-ish.
    frac_r = float(jnp.mean(kept_r.astype(jnp.float32)))
    frac_i = float(jnp.mean(kept_i.astype(jnp.float32)))
    assert 0.35 < frac_r < 0.65 and 0.35 < frac_i < 0.65
    assert bool(jnp.any(kept_r != kept_i))  # real/imag masks differ

    # Real-dtype branch (plain F.dropout path) -> single-plane kernel.
    x_r_only = jax.random.normal(kr, (B, C, H, W), dtype=jnp.float32)
    y_r_only = jax.block_until_ready(
        complex_dropout(x_r_only, p=p, training=True, seed=7))
    kept = jnp.abs(y_r_only) > 0
    assert jnp.allclose(jnp.where(kept, y_r_only, 0.0),
                        jnp.where(kept, x_r_only / (1.0 - p), 0.0), atol=1e-5)
    assert 0.35 < float(jnp.mean(kept.astype(jnp.float32))) < 0.65

    # eval mode is identity
    y_eval = complex_dropout(x, p=p, training=False)
    assert jnp.allclose(jnp.real(y_eval), x_real)
    assert jnp.allclose(jnp.imag(y_eval), x_imag)

    # p=1 edge case matches F.dropout(p=1) -> zeros
    y_all = jax.block_until_ready(complex_dropout(x, p=1.0, training=True))
    assert jnp.allclose(jnp.abs(y_all), 0.0)

    print("KERNEL_OK")
</pallas_src>

<mosaic_0001>
module attributes {stable_mosaic.version = 11 : i64} {
  func.func @_dropout2_kernel(%arg0: i32, %arg1: memref<1xi32, #tpu.memory_space<smem>>, %arg2: memref<8x128xf32, #tpu.memory_space<vmem>>, %arg3: memref<8x128xf32, #tpu.memory_space<vmem>>, %arg4: memref<8x128xf32, #tpu.memory_space<vmem>>, %arg5: memref<8x128xf32, #tpu.memory_space<vmem>>) attributes {dimension_semantics = [#tpu.dimension_semantics<parallel>], iteration_bounds = array<i64: 2>, scalar_prefetch = 1 : i64, scratch_operands = 0 : i64, tpu.core_type = #tpu.core_type<tc>, window_params = [{transform_indices = @transform_0, window_bounds = array<i64: 8, 128>}, {transform_indices = @transform_1, window_bounds = array<i64: 8, 128>}, {transform_indices = @transform_2, window_bounds = array<i64: 8, 128>}, {transform_indices = @transform_3, window_bounds = array<i64: 8, 128>}]} {
    %c1024_i32 = arith.constant 1024 : i32
    %0 = arith.muli %arg0, %c1024_i32 : i32
    %c0 = arith.constant 0 : index
    %1 = memref.load %arg1[%c0] : memref<1xi32, #tpu.memory_space<smem>>
    %c-1640531527_i32 = arith.constant -1640531527 : i32
    %2 = arith.muli %1, %c-1640531527_i32 : i32
    %3 = arith.addi %0, %2 : i32
    %4 = tpu.iota {dimensions = array<i32: 0>} : vector<8x128xi32>
    %5 = tpu.iota {dimensions = array<i32: 1>} : vector<8x128xi32>
    %c7_i32 = arith.constant 7 : i32
    %6 = vector.broadcast %c7_i32 : i32 to vector<8x128xi32>
    %7 = arith.shli %4, %6 : vector<8x128xi32>
    %8 = arith.ori %7, %5 : vector<8x128xi32>
    %9 = vector.broadcast %3 : i32 to vector<8x128xi32>
    %10 = arith.addi %8, %9 : vector<8x128xi32>
    %c16_i32 = arith.constant 16 : i32
    %11 = vector.broadcast %c16_i32 : i32 to vector<8x128xi32>
    %12 = arith.shrui %10, %11 : vector<8x128xi32>
    %13 = arith.xori %10, %12 : vector<8x128xi32>
    %c2146121005_i32 = arith.constant 2146121005 : i32
    %14 = vector.broadcast %c2146121005_i32 : i32 to vector<8x128xi32>
    %15 = arith.muli %13, %14 : vector<8x128xi32>
    %c15_i32 = arith.constant 15 : i32
    %16 = vector.broadcast %c15_i32 : i32 to vector<8x128xi32>
    %17 = arith.shrui %15, %16 : vector<8x128xi32>
    %18 = arith.xori %15, %17 : vector<8x128xi32>
    %c-2073254261_i32 = arith.constant -2073254261 : i32
    %19 = vector.broadcast %c-2073254261_i32 : i32 to vector<8x128xi32>
    %20 = arith.muli %18, %19 : vector<8x128xi32>
    %c16_i32_0 = arith.constant 16 : i32
    %21 = vector.broadcast %c16_i32_0 : i32 to vector<8x128xi32>
    %22 = arith.shrui %20, %21 : vector<8x128xi32>
    %23 = arith.xori %20, %22 : vector<8x128xi32>
    %c65535_i32 = arith.constant 65535 : i32
    %24 = vector.broadcast %c65535_i32 : i32 to vector<8x128xi32>
    %25 = arith.andi %23, %24 : vector<8x128xi32>
    %c32768_i32 = arith.constant 32768 : i32
    %26 = vector.broadcast %c32768_i32 : i32 to vector<8x128xi32>
    %27 = arith.cmpi uge, %25, %26 : vector<8x128xi32>
    %c16_i32_1 = arith.constant 16 : i32
    %28 = vector.broadcast %c16_i32_1 : i32 to vector<8x128xi32>
    %29 = arith.shrui %23, %28 : vector<8x128xi32>
    %c32768_i32_2 = arith.constant 32768 : i32
    %30 = vector.broadcast %c32768_i32_2 : i32 to vector<8x128xi32>
    %31 = arith.cmpi uge, %29, %30 : vector<8x128xi32>
    %c0_3 = arith.constant 0 : index
    %c0_4 = arith.constant 0 : index
    %32 = vector.load %arg2[%c0_3, %c0_4] : memref<8x128xf32, #tpu.memory_space<vmem>>, vector<8x128xf32>
    %cst = arith.constant 2.000000e+00 : f32
    %33 = vector.broadcast %cst : f32 to vector<8x128xf32>
    %34 = arith.mulf %32, %33 : vector<8x128xf32>
    %cst_5 = arith.constant 0.000000e+00 : f32
    %35 = vector.broadcast %cst_5 : f32 to vector<8x128xf32>
    %36 = arith.select %27, %34, %35 : vector<8x128xi1>, vector<8x128xf32>
    %c0_6 = arith.constant 0 : index
    %c0_7 = arith.constant 0 : index
    %37 = vector.load %arg4[%c0_6, %c0_7] : memref<8x128xf32, #tpu.memory_space<vmem>>, vector<8x128xf32>
    tpu.vector_store %arg4[%c0_6, %c0_7], %36 {strides = array<i32>} : memref<8x128xf32, #tpu.memory_space<vmem>>, vector<8x128xf32>,
    %c0_8 = arith.constant 0 : index
    %c0_9 = arith.constant 0 : index
    %38 = vector.load %arg3[%c0_8, %c0_9] : memref<8x128xf32, #tpu.memory_space<vmem>>, vector<8x128xf32>
    %cst_10 = arith.constant 2.000000e+00 : f32
    %39 = vector.broadcast %cst_10 : f32 to vector<8x128xf32>
    %40 = arith.mulf %38, %39 : vector<8x128xf32>
    %cst_11 = arith.constant 0.000000e+00 : f32
    %41 = vector.broadcast %cst_11 : f32 to vector<8x128xf32>
    %42 = arith.select %31, %40, %41 : vector<8x128xi1>, vector<8x128xf32>
    %c0_12 = arith.constant 0 : index
    %c0_13 = arith.constant 0 : index
    %43 = vector.load %arg5[%c0_12, %c0_13] : memref<8x128xf32, #tpu.memory_space<vmem>>, vector<8x128xf32>
    tpu.vector_store %arg5[%c0_12, %c0_13], %42 {strides = array<i32>} : memref<8x128xf32, #tpu.memory_space<vmem>>, vector<8x128xf32>,
    return
  }
  func.func @transform_0(%arg0: i32, %arg1: memref<1xi32, #tpu.memory_space<smem>>) -> (i32, i32) {
    %c0_i32 = arith.constant 0 : i32
    %c0_i32_0 = arith.constant 0 : i32
    return %arg0, %c0_i32 : i32, i32
  }
  func.func @transform_1(%arg0: i32, %arg1: memref<1xi32, #tpu.memory_space<smem>>) -> (i32, i32) {
    %c0_i32 = arith.constant 0 : i32
    %c0_i32_0 = arith.constant 0 : i32
    return %arg0, %c0_i32 : i32, i32
  }
  func.func @transform_2(%arg0: i32, %arg1: memref<1xi32, #tpu.memory_space<smem>>) -> (i32, i32) {
    %c0_i32 = arith.constant 0 : i32
    %c0_i32_0 = arith.constant 0 : i32
    return %arg0, %c0_i32 : i32, i32
  }
  func.func @transform_3(%arg0: i32, %arg1: memref<1xi32, #tpu.memory_space<smem>>) -> (i32, i32) {
    %c0_i32 = arith.constant 0 : i32
    %c0_i32_0 = arith.constant 0 : i32
    return %arg0, %c0_i32 : i32, i32
  }
}

</mosaic_0001>

<bundles_post_ra>
// kernel: tpu_custom_call.1
= control target key start
LH: loop header
LB: loop body
LE: loop exit
PB: predicated region body
PF: predicated region fallthrough
CT: control target
= control target key end

     0   :  { %s899_s0 = inlined_call_operand.<no memory space> [shape: s32[1], index: 0, kind: input, shape index: {}]   ;;  %s900_s1 = inlined_call_operand.hbm [shape: f32[16,128], index: 1, kind: input, shape index: {}]   ;;  %s901_s2 = inlined_call_operand.hbm [shape: f32[16,128], index: 2, kind: input, shape index: {}]   ;;  %s902_s3 = inlined_call_operand.hbm [shape: f32[16,128], index: 3, kind: output, shape index: {0}]   ;;  %s903_s4 = inlined_call_operand.hbm [shape: f32[16,128], index: 4, kind: output, shape index: {1}]  }
   0x1   :  { %10 = sst [smem:[#allocation3]] %s899_s0 }
   0x2   :  { %11 = vsyncpa [#allocation5], 0 }
   0x3   :  { %13 = vsyncpa [#allocation5 + $0x1], 0 }
   0x4   :  { %14 = vsyncpa [#allocation8], 0 }
   0x5   :  { %16 = vsyncpa [#allocation8 + $0x1], 0 }
   0x6   :  { %17 = vsyncpa [#allocation6], 0 }
   0x7   :  { %19 = vsyncpa [#allocation6 + $0x1], 0 }
   0x8   :  { %20 = vsyncpa [#allocation11], 0 }
   0x9   :  { %22 = vsyncpa [#allocation11 + $0x1], 0  ;;  %s706_s17 = smov 0   ;;  %s708_s18 = smov 0  }
   0xa   :  { %s710_s19 = smov 0   ;;  %s712_s20 = smov 0  }
   0xb LB: > { %s727_s0 = sadd.s32 4294967295, %s676_s20   ;;  %s437_s21 = sadd.s32 4294967294, %s676_s20   ;;  %s676_s20 = sphi %s712_s20, %s914_s20   ;;  %s672_s19 = sphi %s710_s19, %s913_s19   ;;  %s668_s18 = sphi %s708_s18, %s912_s18   ;;  %s664_s17 = sphi %s706_s17, %s911_s17  }
   0xc   : > { %s731_s22 = sadd.s32 1, %s676_s20   ;;  %s35_s23 = sadd.s32 1, %s672_s19 }
   0xd   : > { %s32_s24 = ssub.s32 %s676_s20, %s731_s22  ;;  %p42_p0 = scmp.ne.s32.totalorder %s672_s19, %s668_s18 }
   0xe   : > { %p33_p1 = scmp.eq.s32.totalorder %s32_s24, 0  ;;  %p43_p2 = scmp.eq.s32.totalorder %s676_s20, 0 }
   0xf   : > { %p48_p3 = scmp.ne.s32.totalorder %s668_s18, %s664_s17  ;;  %p49_p4 = scmp.eq.s32.totalorder %s727_s0, 0 }
  0x10   : > { %s743_s25 = scalar_select %p33_p1, %s672_s19, %s35_s23  }
  0x11   : > { %p745_p5 = por %p43_p2, %p42_p0  ;;  %p749_p6 = por %p49_p4, %p48_p3 }
  0x12   : > { %p98_p7 = scmp.eq.s32.totalorder %s727_s0, 1  ;;  %p104_p8 = scmp.eq.s32.totalorder %s437_s21, 1 }
  0x13   : > { %p480_p10 = scmp.lt.s32.totalorder %s676_s20, 2  ;;  %s765_s30 = sand.u32 1, %s672_s19  }
  0x14   : > { %p756_p11 = por %p98_p7, %p42_p0  ;;  %p760_p12 = por %p104_p8, %p48_p3 }
  0x15   : > { %s441_s5 = sshll.u32 %s676_s20, 3  ;;  %s440_s6 = sshll.u32 %s765_s30, 3 }
  0x16   : > { %s158_s9 = scalar_lea.hbm %s900_s1, %s441_s5  ;;  %s154_s11 = scalar_lea.vmem [#allocation4], %s440_s6 }
  0x17   : > { %s160_s10 = sshll.u32 %s158_s9, 4  ;;  %s162_s12 = sshll.u32 %s154_s11, 4  ;;  %s161_s10 = int_to_ptr.hbm [resolvable:$true] %s160_s10  ;;  %s163_s12 = int_to_ptr.vmem [resolvable:$true] %s162_s12 }
  0x18   : > { %p774_p13 = pnand %p480_p10, %p745_p5  ;;  %p444_p0 = scmp.ge.s32.totalorder %s676_s20, 1 }
  0x19   : > { %p186_p1 = scmp.lt.s32.totalorder %s676_s20, 3  ;;  %s151_s14 = scalar_lea.sflag [#allocation5], %s765_s30 }
  0x1a   : > { %s514_s15 = sshra.s32 %s161_s10, 4  ;;  %p518_p3 = pneg %p774_p13  ;;  %s515_s15 = int_to_ptr.hbm [resolvable:$true] %s514_s15 }
  0x1b   : > { %s516_s16 = scalar_lea.hbm %s515_s15, 8  ;;  %s521_s24 = scalar_lea.hbm %s900_s1, 16 }
  0x1c   : > { %p517_p2 = scmp.ne.s32.totalorder %s515_s15, %s516_s16  ;;  %p522_p5 = scmp.lt.s32.totalorder %s515_s15, %s900_s1 }
  0x1d   : > { %p523_p8 = scmp.lt.s32.totalorder %s521_s24, %s516_s16 }
  0x1e   : > { %p519_p4 = pnand %p518_p3, %p517_p2 }
  0x1f   : > { %p524_p10 = por %p523_p8, %p522_p5 }
  0x20   : > { %p520_p7 = pneg %p519_p4 }
  0x22   : > { %p525_p9 = pnand %p524_p10, %p520_p7 }
  0x24   : > { %528 = shalt.err (!%p525_p9)
}
  0x25   : > { %469 = dma.hbm_to_vmem [thread:$0]  (!%p774_p13), %s161_s10, 128, %s163_s12, %s151_s14  }
  0x26   : > { %p798_p2 = pnand %p444_p0, %p186_p1  ;;  %s177_s15 = scalar_lea.hbm %s901_s2, %s441_s5 }
  0x27   : > { %s179_s16 = sshll.u32 %s177_s15, 4  ;;  %s173_s21 = scalar_lea.vmem [#allocation7], %s440_s6  ;;  %s180_s16 = int_to_ptr.hbm [resolvable:$true] %s179_s16 }
  0x28   : > { %s181_s23 = sshll.u32 %s173_s21, 4  ;;  %s170_s24 = scalar_lea.sflag [#allocation8], %s765_s30  ;;  %s182_s23 = int_to_ptr.vmem [resolvable:$true] %s181_s23 }
  0x29   : > { %s544_s26 = sshra.s32 %s180_s16, 4  ;;  %s551_s14 = scalar_lea.hbm %s901_s2, 16  ;;  %s545_s26 = int_to_ptr.hbm [resolvable:$true] %s544_s26 }
  0x2a   : > { %s546_s7 = scalar_lea.hbm %s545_s26, 8  ;;  %p552_p4 = scmp.lt.s32.totalorder %s545_s26, %s901_s2 }
  0x2b   : > { %p547_p9 = scmp.ne.s32.totalorder %s545_s26, %s546_s7  ;;  %p553_p7 = scmp.lt.s32.totalorder %s551_s14, %s546_s7 }
  0x2d   : > { %p549_p0 = pnand %p547_p9, %p518_p3  ;;  %p554_p5 = por %p553_p7, %p552_p4 }
  0x2f   : > { %p550_p1 = pneg %p549_p0 }
  0x31   : > { %p555_p8 = pnand %p554_p5, %p550_p1 }
  0x33   : > { %558 = shalt.err (!%p555_p8)
}
  0x34   : > { %472 = dma.hbm_to_vmem [thread:$0]  (!%p774_p13), %s180_s16, 128, %s182_s23, %s170_s24  }
  0x35   : > { %190 = sbr.rel (%p798_p2) target bundleno = 111 (0x6f), region = 28  ;;  %s820_s30 = sand.u32 (!%p798_p2), 1, %s668_s18  }
  0x36   : > { %s823_s6 = sshll.u32 (!%p798_p2), %s820_s30, 3  ;;  %s193_s11 = scalar_lea.sflag (!%p798_p2), [#allocation5], %s820_s30 }
  0x37   : > { %s196_s15 = scalar_lea.vmem (!%p798_p2), [#allocation4], %s823_s6 }
  0x3a   : > { %647 = dma.done.wait (%p749_p6), %s193_s11, 128  }
  0x3b   : > { %649 = vsyncadd (%p749_p6), %s193_s11, 4294967168  ;;  %s203_s13 = scalar_lea.sflag [#allocation8], %s820_s30  ;;  %s206_s8 = scalar_lea.vmem [#allocation7], %s823_s6 }
  0x3c   : > { %651 = dma.done.wait (%p749_p6), %s203_s13, 128  }
  0x3d   : > { %653 = vsyncadd (%p749_p6), %s203_s13, 4294967168  ;;  %v244_v0 = vlaneseq  ;;  %s241_s16 = sld [smem:[#allocation3]]  ;;  %s449_s21 = sshll.u32 %s727_s0, 10  ;;  %v268_v15 = vld [vmem:[%s196_s15] sm:$0xff]  ;;  %v272_v16 = vld [vmem:[%s206_s8] sm:$0xff] }
  0x3e   : > { %s454_s27 = sshll.u32 %s727_s0, 3  ;;  %s232_s5 = scalar_lea.vmem [#allocation9], %s823_s6  ;;  %v269_v19 = vmul.f32 2.0, %v268_v15  ;;  %v273_v20 = vmul.f32 2.0, %v272_v16 }
  0x3f   : > { %v245_v1 = vshrl.u32 %v244_v0, 7  ;;  %v247_v2 = vand.u32 127, %v244_v0  ;;  %s292_s10 = scalar_lea.hbm %s902_s3, %s454_s27  ;;  %s306_s9 = scalar_lea.hbm %s903_s4, %s454_s27 }
  0x40   : > { %s846_s11 = sshll.u32 %s232_s5, 4  ;;  %s239_s0 = scalar_lea.vmem [#allocation10], %s823_s6  ;;  %s295_s11 = int_to_ptr.vmem [resolvable:$true] %s846_s11 }
  0x41   : > { %v248_v3 = vshll.u32 %v245_v1, 7  ;;  %s849_s15 = sshll.u32 %s239_s0, 4  ;;  %s296_s13 = sshll.u32 %s292_s10, 4  ;;  %s309_s15 = int_to_ptr.vmem [resolvable:$true] %s849_s15  ;;  %s297_s13 = int_to_ptr.hbm [resolvable:$true] %s296_s13 }
  0x42   : > { %s310_s8 = sshll.u32 %s306_s9, 4  ;;  %s277_s6 = scalar_lea.sflag [#allocation6], %s820_s30  ;;  %s853_s8 = int_to_ptr.hbm [resolvable:$true] %s310_s8 }
  0x43   : > { %s242_s23 = smul.u32 2654435769, %s241_s16  ;;  %v249_v4 = vor.u32 %v248_v3, %v247_v2  ;;  %s588_s16 = sshra.s32 %s297_s13, 4  ;;  %s589_s16 = int_to_ptr.hbm [resolvable:$true] %s588_s16 }
  0x44   : > { %s594_s27 = scalar_lea.hbm %s902_s3, 16  ;;  %p595_p10 = scmp.lt.s32.totalorder %s589_s16, %s902_s3 }
  0x45   : > { %s243_s24 = sadd.s32 %s449_s21, %s242_s23  ;;  %s590_s21 = scalar_lea.hbm %s589_s16, 8 }
  0x46   : > { %v250_v5 = vstv %s243_s24  ;;  %p591_p6 = scmp.ne.s32.totalorder %s589_s16, %s590_s21  ;;  %p596_p2 = scmp.lt.s32.totalorder %s594_s27, %s590_s21 }
  0x47   : > { %v251_v6 = vadd.s32 %v250_v5, %v249_v4 }
  0x48   : > { %p592_p13 = pnand %p591_p6, %p756_p11  ;;  %p597_p9 = por %p596_p2, %p595_p10 }
  0x49   : > { %v252_v7 = vshrl.u32 %v251_v6, 16 }
  0x4a   : > { %p593_p3 = pneg %p592_p13 }
  0x4b   : > { %v253_v8 = vxor.u32 %v252_v7, %v251_v6 }
  0x4c   : > { %p598_p0 = pnand %p597_p9, %p593_p3 }
  0x4d   : > { %v254_v9 = vmul.u32 2146121005, %v253_v8 }
  0x4f   : > { %v255_v10 = vshrl.u32 %v254_v9, 15 }
  0x51   : > { %v256_v11 = vxor.u32 %v255_v10, %v254_v9 }
  0x53   : > { %v257_v12 = vmul.u32 2221713035, %v256_v11 }
  0x55   : > { %v258_v13 = vshrl.u32 %v257_v12, 16 }
  0x57   : > { %v259_v14 = vxor.u32 %v258_v13, %v257_v12 }
  0x59   : > { %v260_v17 = vand.u32 65535, %v259_v14  ;;  %v264_v18 = vshrl.u32 %v259_v14, 16 }
  0x5b   : > { %v450_v21 = vxor.u32 2147483648, %v260_v17  ;;  %v451_v22 = vxor.u32 2147483648, %v264_v18 }
  0x5d   : > { %vm263_vm0 = vcmp.ge.s32.totalorder %v450_v21, 2147516416  ;;  %vm267_vm1 = vcmp.ge.s32.totalorder %v451_v22, 2147516416 }
  0x5e   : > { %v270_v23 = vsel %vm263_vm0, %v269_v19, 0.0  ;;  %v274_v24 = vsel %vm267_vm1, %v273_v20, 0.0 }
  0x5f   : > { %271 = vst [vmem:[%s232_s5] sm:$0xff] %v270_v23 }
  0x60   : > { %275 = vst [vmem:[%s239_s0] sm:$0xff] %v274_v24 }
  0x61   : > { %601 = shalt.err (!%p598_p0)
}
  0x62   : > { %462 = dma.vmem_to_hbm [thread:$0]  (%p756_p11), %s295_s11, 128, %s297_s13, %s277_s6  }
  0x63   : > { %s282_s10 = scalar_lea.sflag [#allocation11], %s820_s30  ;;  %s616_s12 = sshra.s32 %s853_s8, 4  ;;  %s617_s12 = int_to_ptr.hbm [resolvable:$true] %s616_s12 }
  0x64   : > { %s618_s14 = scalar_lea.hbm %s617_s12, 8  ;;  %s622_s0 = scalar_lea.hbm %s903_s4, 16 }
  0x65   : > { %p619_p1 = scmp.ne.s32.totalorder %s617_s12, %s618_s14  ;;  %p623_p5 = scmp.lt.s32.totalorder %s617_s12, %s903_s4 }
  0x66   : > { %p624_p8 = scmp.lt.s32.totalorder %s622_s0, %s618_s14 }
  0x67   : > { %p620_p4 = pnand %p619_p1, %p756_p11 }
  0x68   : > { %p625_p6 = por %p624_p8, %p623_p5 }
  0x69   : > { %p621_p7 = pneg %p620_p4 }
  0x6b   : > { %p626_p13 = pnand %p625_p6, %p621_p7 }
  0x6d   : > { %629 = shalt.err (!%p626_p13)
}
  0x6e   : > { %463 = dma.vmem_to_hbm [thread:$0]  (%p756_p11), %s309_s15, 128, %s853_s8, %s282_s10  }
  0x6f PF: > { %s322_s30 = sand.u32 1, %s664_s17   ;;  %p910_p3 = scmp.ge.s32.totalorder %s676_s20, 2 }
  0x70   : > { %s323_s11 = scalar_lea.sflag [#allocation6], %s322_s30 }
  0x71   : > { %p474_p10 = pnand %p910_p3, %p760_p12 }
  0x73   : > { %p475_p2 = pneg %p474_p10 }
  0x75   : > { %655 = dma.done.wait (%p475_p2), %s323_s11, 128  }
  0x76   : > { %657 = vsyncadd (%p475_p2), %s323_s11, 4294967168  ;;  %s333_s13 = scalar_lea.sflag [#allocation11], %s322_s30 }
  0x77   : > { %659 = dma.done.wait (%p475_p2), %s333_s13, 128  }
  0x78   : > { %661 = vsyncadd (%p475_p2), %s333_s13, 4294967168  ;;  %p25_p11 = scmp.ge.s32.totalorder %s731_s22, 4   ;;  %s911_s17 = smov %s668_s18 }
  0x79   : > { %s912_s18 = smov %s672_s19  ;;  %s913_s19 = smov %s743_s25 }
  0x7a   : > { %s914_s20 = smov %s731_s22  ;;  %27 = sbr.rel (!%p25_p11) target bundleno = 11 (0xb), region = 103 }
  0x7f   :  { %339 = vsyncpa [#allocation5], 1 }
  0x80   :  { %341 = vsyncpa [#allocation5 + $0x1], 1 }
  0x81   :  { %342 = vsyncpa [#allocation8], 1 }
  0x82   :  { %344 = vsyncpa [#allocation8 + $0x1], 1 }
  0x83   :  { %345 = vsyncpa [#allocation6], 1 }
  0x84   :  { %347 = vsyncpa [#allocation6 + $0x1], 1 }
  0x85   :  { %348 = vsyncpa [#allocation11], 1 }
  0x86   :  { %350 = vsyncpa [#allocation11 + $0x1], 1 }

</bundles_post_ra>
